<compile_context>
chip_gen: v7x
topology: tpu7x:2x2x1
jax: 0.10.0
libtpu: 0.0.40
codegen_flags: <defaults>
</compile_context>

<pallas_src>
import functools

import jax
import jax.numpy as jnp
from jax.experimental import pallas as pl
from jax.experimental.pallas import tpu as pltpu


def _round_up(x, m):
    return ((x + m - 1) // m) * m


def _cdiv(a, b):
    return -(-a // b)


def _actor_kernel(x_ref, w1_ref, b1_ref, w2_ref, b2_ref, w3_ref, b3_ref, o_ref):
    # One batch tile per grid step; weights/biases are VMEM-resident full blocks
    # (constant index_map).  Matmul inputs may be bf16 (MXU fast path); the
    # accumulation and all elementwise epilogue math (bias, ReLU, tanh) stay in
    # f32 so the epilogue is friendly to v5e's f32-only VPU/EUP.
    x = x_ref[...].astype(w1_ref.dtype)          # in-kernel cast: no extra HBM pass

    h1 = jnp.dot(x, w1_ref[...], preferred_element_type=jnp.float32) + b1_ref[...]
    h1 = jnp.maximum(h1, 0.0)                    # ReLU (f32)

    h2 = jnp.dot(h1.astype(w2_ref.dtype), w2_ref[...],
                 preferred_element_type=jnp.float32) + b2_ref[...]
    h2 = jnp.maximum(h2, 0.0)                    # ReLU (f32)

    h3 = jnp.dot(h2.astype(w3_ref.dtype), w3_ref[...],
                 preferred_element_type=jnp.float32) + b3_ref[...]
    # Only the real action columns are stored (masked vst) -- in a mem-bound
    # kernel the 16x write-traffic reduction beats lane-dense padding.
    o_ref[...] = jnp.tanh(h3).astype(o_ref.dtype)


def _vmem_budget_bytes():
    # Per-generation budget: half of physical VMEM, clamped to [16 MiB, 64 MiB]
    # (v5e/v6e: 128 MiB physical -> 64 MiB; v7x: 64 MiB physical -> 32 MiB).
    try:
        cap = int(pltpu.get_tpu_info().vmem_capacity_bytes)
    except Exception:
        cap = 64 * 1024 * 1024
    return max(16 * 1024 * 1024, min(cap // 2, 64 * 1024 * 1024))


@functools.partial(jax.jit, static_argnames=("compute_dtype", "block_batch"))
def actor_forward(state, w1, b1, w2, b2, w3, b3,
                  *, compute_dtype=jnp.bfloat16, block_batch=1024):
    """Fused Actor forward.  Weights are [in, out]; biases are [1, out]."""
    batch, state_size = state.shape
    hidden_size = w1.shape[1]
    action_size = w3.shape[1]
    S, H, A = state_size, hidden_size, action_size

    x_bytes = state.dtype.itemsize
    o_bytes = state.dtype.itemsize
    w_bytes = jnp.dtype(compute_dtype).itemsize

    # ---- batch tile selection against a per-generation VMEM budget ---------
    budget = _vmem_budget_bytes()
    # Pallas double-buffers every input (even constant-index weights), so count
    # resident weights/biases twice.  (pipeline_mode=pl.Buffered(1) would halve
    # this; only relevant for very large hidden sizes.)
    resident = 2 * ((S * H + H * H + H * A) * w_bytes + (2 * H + A) * 4)
    per_row = 2 * (S * x_bytes + A * o_bytes) + (S + 2 * H + A) * 4  # tiles + f32 temps
    headroom = 2 * 1024 * 1024
    max_tb = max(16, ((budget - headroom - resident) // per_row) // 16 * 16)
    cap = max(16, min(block_batch, max_tb))

    if batch <= cap:
        TB = batch                      # single tile: block dims == array dims
        num_tiles = 1
    else:
        # Even number of tiles so the "parallel" batch axis splits cleanly over
        # v7x's two TensorCores; no batch rounding -- the ragged last tile is
        # masked by Pallas instead of DMA'ing / computing garbage rows.
        num_tiles = _cdiv(batch, cap)
        if num_tiles % 2:
            num_tiles += 1
        TB = _round_up(_cdiv(batch, num_tiles), 16)
        num_tiles = _cdiv(batch, TB)

    # Weights go to the MXU in compute_dtype; biases stay f32 for the epilogue.
    w1c, w2c, w3c = (w.astype(compute_dtype) for w in (w1, w2, w3))
    b1c, b2c, b3c = (b.astype(jnp.float32) for b in (b1, b2, b3))

    cost = pl.CostEstimate(
        flops=2 * batch * (S * H + H * H + H * A),
        transcendentals=batch * A,
        bytes_accessed=batch * (S * x_bytes + A * o_bytes)
        + (S * H + H * H + H * A) * w_bytes + (2 * H + A) * 4,
    )

    return pl.pallas_call(
        _actor_kernel,
        out_shape=jax.ShapeDtypeStruct((batch, action_size), state.dtype),
        grid=(num_tiles,),
        in_specs=[
            pl.BlockSpec((TB, S), lambda i: (i, 0)),   # x: streamed per batch tile
            pl.BlockSpec((S, H), lambda i: (0, 0)),    # w1: resident
            pl.BlockSpec((1, H), lambda i: (0, 0)),    # b1: resident
            pl.BlockSpec((H, H), lambda i: (0, 0)),    # w2: resident
            pl.BlockSpec((1, H), lambda i: (0, 0)),    # b2: resident
            pl.BlockSpec((H, A), lambda i: (0, 0)),    # w3: resident
            pl.BlockSpec((1, A), lambda i: (0, 0)),    # b3: resident
        ],
        out_specs=pl.BlockSpec((TB, A), lambda i: (i, 0)),
        compiler_params=pltpu.CompilerParams(
            dimension_semantics=("parallel",),         # shard batch over TCs (v7x)
            vmem_limit_bytes=int(budget),
        ),
        cost_estimate=cost,
    )(state, w1c, b1c, w2c, b2c, w3c, b3c)


def init_actor_params(key, state_size, action_size, hidden_size):
    """Deterministic init mimicking nn.Linear's U(-1/sqrt(fan_in), 1/sqrt(fan_in))."""
    keys = jax.random.split(key, 6)

    def linear(kw, kb, fan_in, fan_out):
        bound = 1.0 / jnp.sqrt(jnp.float32(fan_in))
        w = jax.random.uniform(kw, (fan_in, fan_out), jnp.float32, -bound, bound)
        b = jax.random.uniform(kb, (1, fan_out), jnp.float32, -bound, bound)
        return w, b

    w1, b1 = linear(keys[0], keys[1], state_size, hidden_size)
    w2, b2 = linear(keys[2], keys[3], hidden_size, hidden_size)
    w3, b3 = linear(keys[4], keys[5], hidden_size, action_size)
    return w1, b1, w2, b2, w3, b3


def _reference_forward(state, w1, b1, w2, b2, w3, b3):
    h1 = jnp.maximum(state @ w1 + b1, 0.0)
    h2 = jnp.maximum(h1 @ w2 + b2, 0.0)
    return jnp.tanh(h2 @ w3 + b3)


if __name__ == "__main__":
    state_size, action_size, hidden_size = 16, 8, 32
    batch = 4

    key = jax.random.PRNGKey(0)
    k_params, k_state, k_state2 = jax.random.split(key, 3)
    params = init_actor_params(k_params, state_size, action_size, hidden_size)
    state = jax.random.normal(k_state, (batch, state_size), dtype=jnp.float32)

    # 1) small batch, f32 compute path -- tight tolerance vs reference.
    out = actor_forward(state, *params, compute_dtype=jnp.float32)
    jax.block_until_ready(out)
    ref = _reference_forward(state, *params)
    assert out.shape == (batch, action_size)
    assert jnp.allclose(out, ref, atol=1e-5, rtol=1e-5)

    # 2) larger batch exercising the grid pipeline + ragged (masked) last tile.
    big_batch = 1040
    state_big = jax.random.normal(k_state2, (big_batch, state_size), dtype=jnp.float32)
    out_big = actor_forward(state_big, *params, compute_dtype=jnp.float32)
    jax.block_until_ready(out_big)
    ref_big = _reference_forward(state_big, *params)
    assert out_big.shape == (big_batch, action_size)
    assert jnp.allclose(out_big, ref_big, atol=1e-5, rtol=1e-5)

    # 3) default bf16 MXU-input path (f32 accumulate/epilogue) -- looser tol.
    out_bf16 = actor_forward(state_big, *params)
    jax.block_until_ready(out_bf16)
    assert out_bf16.dtype == jnp.float32
    assert jnp.allclose(out_bf16, ref_big, atol=3e-2, rtol=3e-2)

    print("KERNEL_OK")
</pallas_src>

<mosaic_0001>
module attributes {stable_mosaic.version = 11 : i64} {
  func.func @_actor_kernel(%arg0: i32, %arg1: memref<4x16xf32, #tpu.memory_space<vmem>>, %arg2: memref<16x32xf32, #tpu.memory_space<vmem>>, %arg3: memref<1x32xf32, #tpu.memory_space<vmem>>, %arg4: memref<32x32xf32, #tpu.memory_space<vmem>>, %arg5: memref<1x32xf32, #tpu.memory_space<vmem>>, %arg6: memref<32x8xf32, #tpu.memory_space<vmem>>, %arg7: memref<1x8xf32, #tpu.memory_space<vmem>>, %arg8: memref<4x8xf32, #tpu.memory_space<vmem>>) attributes {dimension_semantics = [#tpu.dimension_semantics<parallel>], iteration_bounds = array<i64: 1>, scalar_prefetch = 0 : i64, scratch_operands = 0 : i64, tpu.core_type = #tpu.core_type<tc>, window_params = [{transform_indices = @transform_0, window_bounds = array<i64: 4, 16>}, {pipeline_mode = #tpu.pipeline_mode<synchronous>, transform_indices = @transform_1, window_bounds = array<i64: 16, 32>}, {pipeline_mode = #tpu.pipeline_mode<synchronous>, transform_indices = @transform_2, window_bounds = array<i64: 1, 32>}, {pipeline_mode = #tpu.pipeline_mode<synchronous>, transform_indices = @transform_3, window_bounds = array<i64: 32, 32>}, {pipeline_mode = #tpu.pipeline_mode<synchronous>, transform_indices = @transform_4, window_bounds = array<i64: 1, 32>}, {pipeline_mode = #tpu.pipeline_mode<synchronous>, transform_indices = @transform_5, window_bounds = array<i64: 32, 8>}, {pipeline_mode = #tpu.pipeline_mode<synchronous>, transform_indices = @transform_6, window_bounds = array<i64: 1, 8>}, {transform_indices = @transform_7, window_bounds = array<i64: 4, 8>}]} {
    %c0 = arith.constant 0 : index
    %c0_0 = arith.constant 0 : index
    %0 = vector.load %arg1[%c0, %c0_0] : memref<4x16xf32, #tpu.memory_space<vmem>>, vector<4x16xf32>
    %c0_1 = arith.constant 0 : index
    %c0_2 = arith.constant 0 : index
    %1 = vector.load %arg2[%c0_1, %c0_2] : memref<16x32xf32, #tpu.memory_space<vmem>>, vector<16x32xf32>
    %cst = arith.constant dense<0.000000e+00> : vector<4x32xf32>
    %2 = tpu.matmul %0, %1, %cst {dimension_numbers = #tpu.dot_dimension_numbers<[1], [0], [0], [1], [0, 0, 1, 1], [], []>} : vector<4x16xf32>, vector<16x32xf32>, vector<4x32xf32> -> vector<4x32xf32>
    %c0_3 = arith.constant 0 : index
    %c0_4 = arith.constant 0 : index
    %3 = vector.load %arg3[%c0_3, %c0_4] : memref<1x32xf32, #tpu.memory_space<vmem>>, vector<1x32xf32>
    %4 = vector.broadcast %3 : vector<1x32xf32> to vector<4x32xf32>
    %5 = arith.addf %2, %4 : vector<4x32xf32>
    %cst_5 = arith.constant 0.000000e+00 : f32
    %6 = vector.broadcast %cst_5 : f32 to vector<4x32xf32>
    %7 = arith.maximumf %5, %6 : vector<4x32xf32>
    %c0_6 = arith.constant 0 : index
    %c0_7 = arith.constant 0 : index
    %8 = vector.load %arg4[%c0_6, %c0_7] : memref<32x32xf32, #tpu.memory_space<vmem>>, vector<32x32xf32>
    %cst_8 = arith.constant dense<0.000000e+00> : vector<4x32xf32>
    %9 = tpu.matmul %7, %8, %cst_8 {dimension_numbers = #tpu.dot_dimension_numbers<[1], [0], [0], [1], [0, 0, 1, 1], [], []>} : vector<4x32xf32>, vector<32x32xf32>, vector<4x32xf32> -> vector<4x32xf32>
    %c0_9 = arith.constant 0 : index
    %c0_10 = arith.constant 0 : index
    %10 = vector.load %arg5[%c0_9, %c0_10] : memref<1x32xf32, #tpu.memory_space<vmem>>, vector<1x32xf32>
    %11 = vector.broadcast %10 : vector<1x32xf32> to vector<4x32xf32>
    %12 = arith.addf %9, %11 : vector<4x32xf32>
    %cst_11 = arith.constant 0.000000e+00 : f32
    %13 = vector.broadcast %cst_11 : f32 to vector<4x32xf32>
    %14 = arith.maximumf %12, %13 : vector<4x32xf32>
    %c0_12 = arith.constant 0 : index
    %c0_13 = arith.constant 0 : index
    %15 = vector.load %arg6[%c0_12, %c0_13] : memref<32x8xf32, #tpu.memory_space<vmem>>, vector<32x8xf32>
    %cst_14 = arith.constant dense<0.000000e+00> : vector<4x8xf32>
    %16 = tpu.matmul %14, %15, %cst_14 {dimension_numbers = #tpu.dot_dimension_numbers<[1], [0], [0], [1], [0, 0, 1, 1], [], []>} : vector<4x32xf32>, vector<32x8xf32>, vector<4x8xf32> -> vector<4x8xf32>
    %c0_15 = arith.constant 0 : index
    %c0_16 = arith.constant 0 : index
    %17 = vector.load %arg7[%c0_15, %c0_16] : memref<1x8xf32, #tpu.memory_space<vmem>>, vector<1x8xf32>
    %18 = vector.broadcast %17 : vector<1x8xf32> to vector<4x8xf32>
    %19 = arith.addf %16, %18 : vector<4x8xf32>
    %20 = math.tanh %19 : vector<4x8xf32>
    %c0_17 = arith.constant 0 : index
    %c0_18 = arith.constant 0 : index
    %21 = vector.load %arg8[%c0_17, %c0_18] : memref<4x8xf32, #tpu.memory_space<vmem>>, vector<4x8xf32>
    tpu.vector_store %arg8[%c0_17, %c0_18], %20 {strides = array<i32>} : memref<4x8xf32, #tpu.memory_space<vmem>>, vector<4x8xf32>,
    return
  }
  func.func @transform_0(%arg0: i32) -> (i32, i32) {
    %c0_i32 = arith.constant 0 : i32
    %c0_i32_0 = arith.constant 0 : i32
    return %arg0, %c0_i32 : i32, i32
  }
  func.func @transform_1(%arg0: i32) -> (i32, i32) {
    %c0_i32 = arith.constant 0 : i32
    %c0_i32_0 = arith.constant 0 : i32
    %c0_i32_1 = arith.constant 0 : i32
    return %c0_i32, %c0_i32_0 : i32, i32
  }
  func.func @transform_2(%arg0: i32) -> (i32, i32) {
    %c0_i32 = arith.constant 0 : i32
    %c0_i32_0 = arith.constant 0 : i32
    %c0_i32_1 = arith.constant 0 : i32
    return %c0_i32, %c0_i32_0 : i32, i32
  }
  func.func @transform_3(%arg0: i32) -> (i32, i32) {
    %c0_i32 = arith.constant 0 : i32
    %c0_i32_0 = arith.constant 0 : i32
    %c0_i32_1 = arith.constant 0 : i32
    return %c0_i32, %c0_i32_0 : i32, i32
  }
  func.func @transform_4(%arg0: i32) -> (i32, i32) {
    %c0_i32 = arith.constant 0 : i32
    %c0_i32_0 = arith.constant 0 : i32
    %c0_i32_1 = arith.constant 0 : i32
    return %c0_i32, %c0_i32_0 : i32, i32
  }
  func.func @transform_5(%arg0: i32) -> (i32, i32) {
    %c0_i32 = arith.constant 0 : i32
    %c0_i32_0 = arith.constant 0 : i32
    %c0_i32_1 = arith.constant 0 : i32
    return %c0_i32, %c0_i32_0 : i32, i32
  }
  func.func @transform_6(%arg0: i32) -> (i32, i32) {
    %c0_i32 = arith.constant 0 : i32
    %c0_i32_0 = arith.constant 0 : i32
    %c0_i32_1 = arith.constant 0 : i32
    return %c0_i32, %c0_i32_0 : i32, i32
  }
  func.func @transform_7(%arg0: i32) -> (i32, i32) {
    %c0_i32 = arith.constant 0 : i32
    %c0_i32_0 = arith.constant 0 : i32
    return %arg0, %c0_i32 : i32, i32
  }
}

</mosaic_0001>

<bundles_post_ra>
// kernel: actor_forward.1
= control target key start
LH: loop header
LB: loop body
LE: loop exit
PB: predicated region body
PF: predicated region fallthrough
CT: control target
= control target key end

     0   :  { %12 = vsyncpa [#allocation3], 0  ;;  %s541_s0 = inlined_call_operand.hbm [shape: f32[4,16], index: 0, kind: input, shape index: {}]   ;;  %s542_s1 = inlined_call_operand.vmem [shape: f32[16,32], index: 1, kind: input, shape index: {}]   ;;  %s543_s2 = inlined_call_operand.vmem [shape: f32[1,32], index: 2, kind: input, shape index: {}]   ;;  %s544_s3 = inlined_call_operand.vmem [shape: f32[32,32], index: 3, kind: input, shape index: {}]   ;;  %s545_s4 = inlined_call_operand.vmem [shape: f32[1,32], index: 4, kind: input, shape index: {}]   ;;  %s546_s5 = inlined_call_operand.vmem [shape: f32[32,8], index: 5, kind: input, shape index: {}]   ;;  %s547_s6 = inlined_call_operand.vmem [shape: f32[1,8], index: 6, kind: input, shape index: {}]   ;;  %s548_s7 = inlined_call_operand.hbm [shape: f32[4,8], index: 7, kind: output, shape index: {}]  }
   0x1   :  { %13 = vsyncpa [#allocation4], 0  ;;  %s430_s24 = smov [#allocation2]   ;;  %s382_s28 = scalar_lea.hbm %s541_s0, 64 }
   0x2   :  { %s20_s25 = sshll.u32 %s430_s24, 4  ;;  %p383_p0 = scmp.ne.s32.totalorder %s541_s0, %s382_s28  ;;  %s21_s25 = int_to_ptr.vmem [resolvable:$true] %s20_s25 }
   0x3   :  { %p386_p1 = scmp.lt.u32.totalorder %s382_s28, %s541_s0 }
   0x5   :  { %p388_p2 = pnand %p386_p1, %p383_p0 }
   0x7   :  { %391 = shalt.err (!%p388_p2)
}
   0x8   :  { %s392_s10 = scalar_lea.vmem %s21_s25, 64  ;;  %p397_p4 = scmp.lt.s32.totalorder %s21_s25, %s21_s25 }
   0x9   :  { %p393_p3 = scmp.ne.s32.totalorder %s21_s25, %s392_s10  ;;  %p398_p5 = scmp.lt.s32.totalorder %s392_s10, %s392_s10 }
   0xb   :  { %p399_p6 = por %p398_p5, %p397_p4 }
   0xd   :  { %p400_p7 = pnand %p399_p6, %p393_p3 }
   0xf   :  { %403 = shalt.err (!%p400_p7)
}
  0x10   :  { %23 = dma.hbm_to_vmem [thread:$0]  %s541_s0, 64, %s21_s25, [#allocation3]  }
  0x11   :  { %426 = dma.done.wait [#allocation3], 64  }
  0x12   :  { %427 = vsyncadd [#allocation3], 4294967232  ;;  %v431_v0 = vmov 0.0|0.0   ;;  %vm432_vm0 = vmmov 0   ;;  %v433_v1 = vmov 0.0   ;;  %v40_v2 = vld [vmem:[%s542_s1] sm:$0xff] }
  0x13   :  { %360 = vmatprep.subr.bf16.mxu0 %v431_v0  ;;  %335 = vmatprep.mubr.msk.f32.mxu0 %vm432_vm0, %v433_v1  ;;  %v41_v3 = vld [vmem:[%s542_s1 + $0x8] sm:$0xff]  ;;  %v124_v5 = vld [vmem:[%s544_s3] sm:$0xff]  ;;  %vm49_vm1 = vcmask 130048   ;;  %v126_v9 = vld [vmem:[%s544_s3 + $0x10] sm:$0xff]  ;;  %vm135_vm2 = vcmask 261120   ;;  %vm295_vm3 = vcmask 60416  }
  0x14   :  { %363 = vmatprep.subr.bf16.mxu1 %v431_v0  ;;  %346 = vmatprep.mubr.msk.f32.mxu1 %vm432_vm0, %v433_v1  ;;  %v361_v4 = vpack.c.bf16 %v41_v3, %v40_v2  ;;  %v125_v6 = vld [vmem:[%s544_s3 + $0x8] sm:$0xff]  ;;  %v39_v8 = vld [vmem:[#allocation2] sm:$0xf]  ;;  %v127_v10 = vld [vmem:[%s544_s3 + $0x18] sm:$0xff] }
  0x15   :  { %v364_v7 = vpack.c.bf16 %v125_v6, %v124_v5  ;;  %v367_v11 = vpack.c.bf16 %v127_v10, %v126_v9  ;;  %v210_v12 = vld [vmem:[%s546_s5] sm:$0xff]  ;;  %v211_v13 = vld [vmem:[%s546_s5 + $0x8] sm:$0xff]  ;;  %v212_v20 = vld [vmem:[%s546_s5 + $0x10] sm:$0xff] }
  0x16   :  { %362 = vmatpush3.bf16.msra.mxu0 %v361_v4  ;;  %v370_v14 = vpack.c.bf16 %v211_v13, %v210_v12  ;;  %v312_v15 = vld [vmem:[%s543_s2] ss:$0 sm:$0xff]  ;;  %v213_v21 = vld [vmem:[%s546_s5 + $0x18] sm:$0xff]  ;;  %s434_s5 = smov [#allocation5]  }
  0x17   :  { %365 = vmatpush3.bf16.msra.mxu1 %v364_v7  ;;  %369 = vmatprep.subr.bf16.mxu0 %v431_v0  ;;  %v373_v22 = vpack.c.bf16 %v213_v21, %v212_v20  ;;  %v314_v23 = vld [vmem:[%s545_s4] ss:$0 sm:$0xff]  ;;  %s303_s12 = sshll.u32 %s434_s5, 4  ;;  %s304_s12 = int_to_ptr.vmem [resolvable:$true] %s303_s12 }
  0x18   :  { %366 = vmatprep.subr.bf16.mxu1 %v431_v0  ;;  %v316_v28 = vld [vmem:[%s547_s6] ss:$0 sm:$0xff]  ;;  %s404_s4 = scalar_lea.vmem %s304_s12, 64  ;;  %p409_p9 = scmp.lt.s32.totalorder %s304_s12, %s304_s12 }
  0x19   :  { %336 = vmatmul.mubr.msk.f32.vlgmr.msra.gmra.mrb[0].mxu0 %vm49_vm1, %v39_v8  ;;  %p405_p8 = scmp.ne.s32.totalorder %s304_s12, %s404_s4  ;;  %p410_p10 = scmp.lt.s32.totalorder %s404_s4, %s404_s4 }
  0x1a   :  { %357 = vmatprep.mubr.msk.f32.mxu0 %vm432_vm0, %v433_v1  ;;  %371 = vmatpush3.bf16.msra.mxu0 %v370_v14 }
  0x1b   :  { %368 = vmatpush3.bf16.msra.mxu1 %v367_v11  ;;  %372 = vmatprep.subr.bf16.mxu0 %v431_v0  ;;  %p411_p11 = por %p410_p10, %p409_p9 }
  0x1d   :  { %p412_p12 = pnand %p411_p11, %p405_p8 }
  0x1e   :  { %374 = vmatpush3.bf16.msra.mxu0 %v373_v22 }
  0xec   :  { %v119_v16 = vpop.f32.mrb[0].mxu0 }
  0xed   :  { %v120_v17 = vadd.f32 %v312_v15, %v119_v16  ;;  %v337_v18 = vpop.f32.mrb[1].mxu0 }
  0xef   :  { %v123_v19 = vmax.f32 %v120_v17, 0.0 }
  0xf1   :  { %347 = vmatmul.mubr.msk.f32.vlgmr.msra.gmra.mrb[0].mxu1 %vm135_vm2, %v123_v19 }
 0x1c4   :  { %v205_v24 = vpop.f32.mrb[0].mxu1 }
 0x1c5   :  { %v206_v25 = vadd.f32 %v314_v23, %v205_v24  ;;  %v348_v26 = vpop.f32.mrb[1].mxu1 }
 0x1c7   :  { %v209_v27 = vmax.f32 %v206_v25, 0.0 }
 0x1c9   :  { %358 = vmatmul.mubr.msk.f32.vlgmr.msra.gmra.mrb[2].mxu0 %vm135_vm2, %v209_v27 }
 0x29c   :  { %v290_v29 = vpop.f32.mrb[2].mxu0 }
 0x29d   :  { %v291_v30 = vadd.f32 %v316_v28, %v290_v29  ;;  %v359_v31 = vpop.f32.mrb[3].mxu0 }
 0x29f   :  { %380 = vtanh.f32 %v291_v30 }
 0x2a9   :  { %v381_v32 = vpop.eup %380 }
 0x2aa   :  { %296 = vst.msk [vmem:[#allocation5] sm:$0xf] %vm295_vm3, %v381_v32 }
 0x2ab   :  { %415 = shalt.err (!%p412_p12)
}
 0x2ac   :  { %s416_s6 = scalar_lea.hbm %s548_s7, 64 }
 0x2ad   :  { %p417_p13 = scmp.ne.s32.totalorder %s548_s7, %s416_s6  ;;  %p420_p0 = scmp.lt.u32.totalorder %s416_s6, %s548_s7 }
 0x2af   :  { %p422_p1 = pnand %p420_p0, %p417_p13 }
 0x2b1   :  { %425 = shalt.err (!%p422_p1)
}
 0x2b2   :  { %306 = dma.vmem_to_hbm [thread:$0]  %s304_s12, 64, %s548_s7, [#allocation4]  }
 0x2b3   :  { %428 = dma.done.wait [#allocation4], 64  }
 0x2b4   :  { %429 = vsyncadd [#allocation4], 4294967232 }
 0x2b5   :  { %310 = vsyncpa [#allocation3], 1 }
 0x2b6   :  { %311 = vsyncpa [#allocation4], 1 }

</bundles_post_ra>
